<compile_context>
chip_gen: v5e
topology: v5e:2x2
jax: 0.10.0
libtpu: 0.0.40
codegen_flags: <defaults>
</compile_context>

<pallas_src>
import jax
import jax.numpy as jnp
import numpy as np
from jax import lax
from jax.experimental import pallas as pl
from jax.experimental.pallas import tpu as pltpu

# ---------------------------------------------------------------------------
# Model hyperparameters (small, consistent with the module's forward).
# ---------------------------------------------------------------------------
B = 2          # batch
T = 8          # sequence length
EMB = 32       # embedding dim
HEADS = 4      # attention heads (SelfAttentionWide: per-head dim == EMB)
FF_MULT = 4    # ff hidden = 4 * EMB
LN_EPS = 1e-5  # torch.nn.LayerNorm default


# ---------------------------------------------------------------------------
# Pallas kernel: one TransformerBlock forward for the WHOLE batch.
# ---------------------------------------------------------------------------
def transformer_block_kernel(
    x_ref,       # (B, T, E)
    wqkvT_ref,   # (E, 3*H*E)   columns = [Wq^T | Wk^T | Wv^T]
    wuT_ref,     # (H*E, E)
    w1T_ref,     # (E, FF)
    w2T_ref,     # (FF, E)
    bf1_ref,     # (1, FF)
    vecs_ref,    # (6, E) rows = [bu, ln1_gamma, ln1_beta, bf2, ln2_gamma, ln2_beta]
    o_ref,       # (B, T, E)
):
    b, t, e = x_ref.shape
    he = wuT_ref.shape[0]          # heads * emb
    h = he // e

    # Token-wise ops run on the folded (B*T, E) view (leading-dim reshape: layout-free).
    x2 = x_ref[...].reshape(b * t, e)

    # --- fused QKV projection: one lane-dense MXU pass instead of three ---
    qkv = jnp.dot(x2, wqkvT_ref[...], preferred_element_type=jnp.float32)   # (B*T, 3*H*E)

    # Fold both 1/e^0.25 scalings into a single 1/sqrt(e) multiply on q.
    qf = qkv[:, 0:he] * (float(e) ** -0.5)     # 128-lane-aligned slices
    kf = qkv[:, he:2 * he]
    vf = qkv[:, 2 * he:3 * he]

    q3 = qf.reshape(b, t, he)                  # split of the sublane dim: layout-free
    k3 = kf.reshape(b, t, he)
    v3 = vf.reshape(b, t, he)

    # --- per-head attention, batched over B; unifyheads folded into the loop (no concat) ---
    att = jnp.zeros((b * t, e), jnp.float32)
    for hi in range(h):
        c0, c1 = hi * e, (hi + 1) * e
        q = q3[:, :, c0:c1]                    # (B, T, E)
        k = k3[:, :, c0:c1]
        v = v3[:, :, c0:c1]
        s = jnp.einsum("bqe,bke->bqk", q, k, preferred_element_type=jnp.float32)  # (B, T, T)
        s = s - jnp.max(s, axis=-1, keepdims=True)
        p = jnp.exp(s)
        p = p * pl.reciprocal(jnp.sum(p, axis=-1, keepdims=True), approx=False)
        o_h = jnp.einsum("bqk,bke->bqe", p, v, preferred_element_type=jnp.float32)  # (B, T, E)
        # unifyheads contribution of this head (avoids concatenating heads on the lane dim)
        att = att + jnp.dot(o_h.reshape(b * t, e), wuT_ref[c0:c1, :],
                            preferred_element_type=jnp.float32)
    attended = att + vecs_ref[0:1, :]          # + unifyheads bias

    def layernorm(a, g, beta):
        mu = jnp.mean(a, axis=-1, keepdims=True)
        d = a - mu
        var = jnp.mean(d * d, axis=-1, keepdims=True)
        return d * lax.rsqrt(var + LN_EPS) * g + beta   # rsqrt -> EUP slot

    # --- residual + LayerNorm 1 (dropout p=0.0 -> identity) ---
    n1 = layernorm(attended + x2, vecs_ref[1:2, :], vecs_ref[2:3, :])

    # --- feed-forward: Linear -> ReLU -> Linear ---
    h1 = jnp.maximum(
        jnp.dot(n1, w1T_ref[...], preferred_element_type=jnp.float32) + bf1_ref[...], 0.0)
    ff = jnp.dot(h1, w2T_ref[...], preferred_element_type=jnp.float32) + vecs_ref[3:4, :]

    # --- residual + LayerNorm 2 ---
    y = layernorm(ff + n1, vecs_ref[4:5, :], vecs_ref[5:6, :])
    o_ref[...] = y.reshape(b, t, e)


# ---------------------------------------------------------------------------
# Wrapper: pack weights, build specs, invoke pallas_call (single invocation, no grid).
# ---------------------------------------------------------------------------
def transformer_block(x, params):
    b, t, e = x.shape
    # Fused QKV weight (E, 3*H*E) and packed per-channel vectors (6, E).
    wqkvT = jnp.concatenate([params["wqT"], params["wkT"], params["wvT"]], axis=1)
    vecs = jnp.concatenate(
        [params["bu"], params["g1"], params["be1"],
         params["bf2"], params["g2"], params["be2"]], axis=0)

    he = params["wuT"].shape[0]
    h = he // e
    ff = params["w1T"].shape[1]

    flops = int(2 * b * t * (e * 3 * he + he * e + 2 * e * ff) + 4 * b * h * t * t * e)
    transcendentals = int(b * h * t * t + 4 * b * t)   # exp + rsqrt/reciprocal
    weight_bytes = 4 * (wqkvT.size + params["wuT"].size + params["w1T"].size
                        + params["w2T"].size + params["bf1"].size + vecs.size)
    bytes_accessed = int(weight_bytes + 4 * 2 * x.size)

    vmem = pl.BlockSpec(memory_space=pltpu.MemorySpace.VMEM)
    args = (x, wqkvT, params["wuT"], params["w1T"], params["w2T"], params["bf1"], vecs)

    return pl.pallas_call(
        transformer_block_kernel,
        out_shape=jax.ShapeDtypeStruct((b, t, e), jnp.float32),
        in_specs=[vmem] * len(args),
        out_specs=vmem,
        cost_estimate=pl.CostEstimate(flops=flops, transcendentals=transcendentals,
                                      bytes_accessed=bytes_accessed),
    )(*args)


# ---------------------------------------------------------------------------
# Pure-JAX reference (mirrors the PyTorch forward exactly) for verification.
# ---------------------------------------------------------------------------
def reference_block(x, params):
    b, t, e = x.shape
    h = HEADS
    keys = (x @ params["wkT"]).reshape(b, t, h, e)
    queries = (x @ params["wqT"]).reshape(b, t, h, e)
    values = (x @ params["wvT"]).reshape(b, t, h, e)
    keys = jnp.transpose(keys, (0, 2, 1, 3)).reshape(b * h, t, e)
    queries = jnp.transpose(queries, (0, 2, 1, 3)).reshape(b * h, t, e)
    values = jnp.transpose(values, (0, 2, 1, 3)).reshape(b * h, t, e)
    queries = queries / e ** 0.25
    keys = keys / e ** 0.25
    dot = jnp.einsum("bqe,bke->bqk", queries, keys)
    dot = jax.nn.softmax(dot, axis=2)
    out = jnp.einsum("bqk,bke->bqe", dot, values).reshape(b, h, t, e)
    out = jnp.transpose(out, (0, 2, 1, 3)).reshape(b, t, h * e)
    attended = out @ params["wuT"] + params["bu"][0]

    def layernorm(a, g, be):
        mu = jnp.mean(a, axis=-1, keepdims=True)
        var = jnp.mean((a - mu) ** 2, axis=-1, keepdims=True)
        return (a - mu) / jnp.sqrt(var + LN_EPS) * g[0] + be[0]

    x1 = layernorm(attended + x, params["g1"], params["be1"])
    ffw = jnp.maximum(x1 @ params["w1T"] + params["bf1"][0], 0.0) @ params["w2T"] + params["bf2"][0]
    return layernorm(ffw + x1, params["g2"], params["be2"])


# ---------------------------------------------------------------------------
# Deterministic parameter init (synthetic; shapes follow the module __init__).
# ---------------------------------------------------------------------------
def init_params(key):
    ks = jax.random.split(key, 12)
    he = HEADS * EMB
    ff = FF_MULT * EMB
    s = 0.1
    return {
        # SelfAttentionWide (stored pre-transposed: (in, out)), y = x @ W^T
        "wqT": s * jax.random.normal(ks[0], (EMB, he), jnp.float32),
        "wkT": s * jax.random.normal(ks[1], (EMB, he), jnp.float32),
        "wvT": s * jax.random.normal(ks[2], (EMB, he), jnp.float32),
        "wuT": s * jax.random.normal(ks[3], (he, EMB), jnp.float32),
        "bu": s * jax.random.normal(ks[4], (1, EMB), jnp.float32),
        # LayerNorm 1 (perturbed so the affine path is actually exercised)
        "g1": 1.0 + s * jax.random.normal(ks[5], (1, EMB), jnp.float32),
        "be1": s * jax.random.normal(ks[6], (1, EMB), jnp.float32),
        # feed-forward
        "w1T": s * jax.random.normal(ks[7], (EMB, ff), jnp.float32),
        "bf1": s * jax.random.normal(ks[8], (1, ff), jnp.float32),
        "w2T": s * jax.random.normal(ks[9], (ff, EMB), jnp.float32),
        "bf2": s * jax.random.normal(ks[10], (1, EMB), jnp.float32),
        # LayerNorm 2
        "g2": 1.0 + s * jax.random.normal(ks[11], (1, EMB), jnp.float32),
        "be2": jnp.zeros((1, EMB), jnp.float32),
    }


if __name__ == "__main__":
    key = jax.random.PRNGKey(0)
    kx, kp = jax.random.split(key)
    x = jax.random.normal(kx, (B, T, EMB), jnp.float32)
    params = init_params(kp)

    out = jax.block_until_ready(transformer_block(x, params))
    ref = jax.block_until_ready(reference_block(x, params))
    np.testing.assert_allclose(np.asarray(out), np.asarray(ref), rtol=1e-4, atol=1e-4)

    print("KERNEL_OK")
</pallas_src>

<mosaic_0001>
module attributes {stable_mosaic.version = 11 : i64} {
  func.func @transformer_block_kernel(%arg0: memref<2x8x32xf32, #tpu.memory_space<vmem>>, %arg1: memref<32x384xf32, #tpu.memory_space<vmem>>, %arg2: memref<128x32xf32, #tpu.memory_space<vmem>>, %arg3: memref<32x128xf32, #tpu.memory_space<vmem>>, %arg4: memref<128x32xf32, #tpu.memory_space<vmem>>, %arg5: memref<1x128xf32, #tpu.memory_space<vmem>>, %arg6: memref<6x32xf32, #tpu.memory_space<vmem>>, %arg7: memref<2x8x32xf32, #tpu.memory_space<vmem>>) attributes {dimension_semantics = [], scalar_prefetch = 0 : i64, scratch_operands = 0 : i64, tpu.core_type = #tpu.core_type<tc>} {
    %c0 = arith.constant 0 : index
    %c0_0 = arith.constant 0 : index
    %c0_1 = arith.constant 0 : index
    %0 = vector.load %arg0[%c0, %c0_0, %c0_1] : memref<2x8x32xf32, #tpu.memory_space<vmem>>, vector<2x8x32xf32>
    %1 = vector.shape_cast %0 : vector<2x8x32xf32> to vector<16x32xf32>
    %c0_2 = arith.constant 0 : index
    %c0_3 = arith.constant 0 : index
    %2 = vector.load %arg1[%c0_2, %c0_3] : memref<32x384xf32, #tpu.memory_space<vmem>>, vector<32x384xf32>
    %cst = arith.constant dense<0.000000e+00> : vector<16x384xf32>
    %3 = tpu.matmul %1, %2, %cst {dimension_numbers = #tpu.dot_dimension_numbers<[1], [0], [0], [1], [0, 0, 1, 1], [], []>} : vector<16x32xf32>, vector<32x384xf32>, vector<16x384xf32> -> vector<16x384xf32>
    %4 = vector.extract_strided_slice %3 {offsets = [0, 0], sizes = [16, 128], strides = [1, 1]} : vector<16x384xf32> to vector<16x128xf32>
    %cst_4 = arith.constant 0.176776692 : f32
    %5 = vector.broadcast %cst_4 : f32 to vector<16x128xf32>
    %6 = arith.mulf %4, %5 : vector<16x128xf32>
    %7 = vector.extract_strided_slice %3 {offsets = [0, 128], sizes = [16, 128], strides = [1, 1]} : vector<16x384xf32> to vector<16x128xf32>
    %8 = vector.extract_strided_slice %3 {offsets = [0, 256], sizes = [16, 128], strides = [1, 1]} : vector<16x384xf32> to vector<16x128xf32>
    %9 = vector.shape_cast %6 : vector<16x128xf32> to vector<2x8x128xf32>
    %10 = vector.shape_cast %7 : vector<16x128xf32> to vector<2x8x128xf32>
    %11 = vector.shape_cast %8 : vector<16x128xf32> to vector<2x8x128xf32>
    %cst_5 = arith.constant 0.000000e+00 : f32
    %12 = vector.broadcast %cst_5 : f32 to vector<16x32xf32>
    %13 = vector.extract_strided_slice %9 {offsets = [0, 0, 0], sizes = [2, 8, 32], strides = [1, 1, 1]} : vector<2x8x128xf32> to vector<2x8x32xf32>
    %14 = vector.extract_strided_slice %10 {offsets = [0, 0, 0], sizes = [2, 8, 32], strides = [1, 1, 1]} : vector<2x8x128xf32> to vector<2x8x32xf32>
    %15 = vector.extract_strided_slice %11 {offsets = [0, 0, 0], sizes = [2, 8, 32], strides = [1, 1, 1]} : vector<2x8x128xf32> to vector<2x8x32xf32>
    "tpu.trace_start"() <{level = 10 : i32, message = "bqe,bke->bqk"}> : () -> ()
    %cst_6 = arith.constant dense<0.000000e+00> : vector<2x8x8xf32>
    %16 = tpu.matmul %13, %14, %cst_6 {dimension_numbers = #tpu.dot_dimension_numbers<[2], [2], [1], [1], [0, 0, 0, 1, 1, 1], [0], [0]>} : vector<2x8x32xf32>, vector<2x8x32xf32>, vector<2x8x8xf32> -> vector<2x8x8xf32>
    "tpu.trace_stop"() : () -> ()
    %cst_7 = arith.constant dense<0xFF800000> : vector<2x8xf32>
    %17 = vector.multi_reduction <maximumf>, %16, %cst_7 [2] : vector<2x8x8xf32> to vector<2x8xf32>
    %18 = vector.shape_cast %17 : vector<2x8xf32> to vector<2x8x1xf32>
    %19 = vector.broadcast %18 : vector<2x8x1xf32> to vector<2x8x8xf32>
    %20 = arith.subf %16, %19 : vector<2x8x8xf32>
    %21 = math.exp %20 : vector<2x8x8xf32>
    %cst_8 = arith.constant dense<0.000000e+00> : vector<2x8xf32>
    %22 = vector.multi_reduction <add>, %21, %cst_8 [2] : vector<2x8x8xf32> to vector<2x8xf32>
    %23 = vector.shape_cast %22 : vector<2x8xf32> to vector<2x8x1xf32>
    %24 = tpu.reciprocal %23 : vector<2x8x1xf32> -> vector<2x8x1xf32>
    %25 = vector.broadcast %24 : vector<2x8x1xf32> to vector<2x8x8xf32>
    %26 = arith.mulf %21, %25 : vector<2x8x8xf32>
    "tpu.trace_start"() <{level = 10 : i32, message = "bqk,bke->bqe"}> : () -> ()
    %cst_9 = arith.constant dense<0.000000e+00> : vector<2x8x32xf32>
    %27 = tpu.matmul %26, %15, %cst_9 {dimension_numbers = #tpu.dot_dimension_numbers<[2], [1], [1], [2], [0, 0, 0, 1, 1, 2], [0], [0]>} : vector<2x8x8xf32>, vector<2x8x32xf32>, vector<2x8x32xf32> -> vector<2x8x32xf32>
    "tpu.trace_stop"() : () -> ()
    %28 = vector.shape_cast %27 : vector<2x8x32xf32> to vector<16x32xf32>
    %c0_10 = arith.constant 0 : index
    %c0_11 = arith.constant 0 : index
    %29 = vector.load %arg2[%c0_10, %c0_11] : memref<128x32xf32, #tpu.memory_space<vmem>>, vector<32x32xf32>
    %cst_12 = arith.constant dense<0.000000e+00> : vector<16x32xf32>
    %30 = tpu.matmul %28, %29, %cst_12 {dimension_numbers = #tpu.dot_dimension_numbers<[1], [0], [0], [1], [0, 0, 1, 1], [], []>} : vector<16x32xf32>, vector<32x32xf32>, vector<16x32xf32> -> vector<16x32xf32>
    %31 = arith.addf %12, %30 : vector<16x32xf32>
    %32 = vector.extract_strided_slice %9 {offsets = [0, 0, 32], sizes = [2, 8, 32], strides = [1, 1, 1]} : vector<2x8x128xf32> to vector<2x8x32xf32>
    %33 = vector.extract_strided_slice %10 {offsets = [0, 0, 32], sizes = [2, 8, 32], strides = [1, 1, 1]} : vector<2x8x128xf32> to vector<2x8x32xf32>
    %34 = vector.extract_strided_slice %11 {offsets = [0, 0, 32], sizes = [2, 8, 32], strides = [1, 1, 1]} : vector<2x8x128xf32> to vector<2x8x32xf32>
    "tpu.trace_start"() <{level = 10 : i32, message = "bqe,bke->bqk"}> : () -> ()
    %cst_13 = arith.constant dense<0.000000e+00> : vector<2x8x8xf32>
    %35 = tpu.matmul %32, %33, %cst_13 {dimension_numbers = #tpu.dot_dimension_numbers<[2], [2], [1], [1], [0, 0, 0, 1, 1, 1], [0], [0]>} : vector<2x8x32xf32>, vector<2x8x32xf32>, vector<2x8x8xf32> -> vector<2x8x8xf32>
    "tpu.trace_stop"() : () -> ()
    %cst_14 = arith.constant dense<0xFF800000> : vector<2x8xf32>
    %36 = vector.multi_reduction <maximumf>, %35, %cst_14 [2] : vector<2x8x8xf32> to vector<2x8xf32>
    %37 = vector.shape_cast %36 : vector<2x8xf32> to vector<2x8x1xf32>
    %38 = vector.broadcast %37 : vector<2x8x1xf32> to vector<2x8x8xf32>
    %39 = arith.subf %35, %38 : vector<2x8x8xf32>
    %40 = math.exp %39 : vector<2x8x8xf32>
    %cst_15 = arith.constant dense<0.000000e+00> : vector<2x8xf32>
    %41 = vector.multi_reduction <add>, %40, %cst_15 [2] : vector<2x8x8xf32> to vector<2x8xf32>
    %42 = vector.shape_cast %41 : vector<2x8xf32> to vector<2x8x1xf32>
    %43 = tpu.reciprocal %42 : vector<2x8x1xf32> -> vector<2x8x1xf32>
    %44 = vector.broadcast %43 : vector<2x8x1xf32> to vector<2x8x8xf32>
    %45 = arith.mulf %40, %44 : vector<2x8x8xf32>
    "tpu.trace_start"() <{level = 10 : i32, message = "bqk,bke->bqe"}> : () -> ()
    %cst_16 = arith.constant dense<0.000000e+00> : vector<2x8x32xf32>
    %46 = tpu.matmul %45, %34, %cst_16 {dimension_numbers = #tpu.dot_dimension_numbers<[2], [1], [1], [2], [0, 0, 0, 1, 1, 2], [0], [0]>} : vector<2x8x8xf32>, vector<2x8x32xf32>, vector<2x8x32xf32> -> vector<2x8x32xf32>
    "tpu.trace_stop"() : () -> ()
    %47 = vector.shape_cast %46 : vector<2x8x32xf32> to vector<16x32xf32>
    %c32 = arith.constant 32 : index
    %c0_17 = arith.constant 0 : index
    %48 = vector.load %arg2[%c32, %c0_17] : memref<128x32xf32, #tpu.memory_space<vmem>>, vector<32x32xf32>
    %cst_18 = arith.constant dense<0.000000e+00> : vector<16x32xf32>
    %49 = tpu.matmul %47, %48, %cst_18 {dimension_numbers = #tpu.dot_dimension_numbers<[1], [0], [0], [1], [0, 0, 1, 1], [], []>} : vector<16x32xf32>, vector<32x32xf32>, vector<16x32xf32> -> vector<16x32xf32>
    %50 = arith.addf %31, %49 : vector<16x32xf32>
    %51 = vector.extract_strided_slice %9 {offsets = [0, 0, 64], sizes = [2, 8, 32], strides = [1, 1, 1]} : vector<2x8x128xf32> to vector<2x8x32xf32>
    %52 = vector.extract_strided_slice %10 {offsets = [0, 0, 64], sizes = [2, 8, 32], strides = [1, 1, 1]} : vector<2x8x128xf32> to vector<2x8x32xf32>
    %53 = vector.extract_strided_slice %11 {offsets = [0, 0, 64], sizes = [2, 8, 32], strides = [1, 1, 1]} : vector<2x8x128xf32> to vector<2x8x32xf32>
    "tpu.trace_start"() <{level = 10 : i32, message = "bqe,bke->bqk"}> : () -> ()
    %cst_19 = arith.constant dense<0.000000e+00> : vector<2x8x8xf32>
    %54 = tpu.matmul %51, %52, %cst_19 {dimension_numbers = #tpu.dot_dimension_numbers<[2], [2], [1], [1], [0, 0, 0, 1, 1, 1], [0], [0]>} : vector<2x8x32xf32>, vector<2x8x32xf32>, vector<2x8x8xf32> -> vector<2x8x8xf32>
    "tpu.trace_stop"() : () -> ()
    %cst_20 = arith.constant dense<0xFF800000> : vector<2x8xf32>
    %55 = vector.multi_reduction <maximumf>, %54, %cst_20 [2] : vector<2x8x8xf32> to vector<2x8xf32>
    %56 = vector.shape_cast %55 : vector<2x8xf32> to vector<2x8x1xf32>
    %57 = vector.broadcast %56 : vector<2x8x1xf32> to vector<2x8x8xf32>
    %58 = arith.subf %54, %57 : vector<2x8x8xf32>
    %59 = math.exp %58 : vector<2x8x8xf32>
    %cst_21 = arith.constant dense<0.000000e+00> : vector<2x8xf32>
    %60 = vector.multi_reduction <add>, %59, %cst_21 [2] : vector<2x8x8xf32> to vector<2x8xf32>
    %61 = vector.shape_cast %60 : vector<2x8xf32> to vector<2x8x1xf32>
    %62 = tpu.reciprocal %61 : vector<2x8x1xf32> -> vector<2x8x1xf32>
    %63 = vector.broadcast %62 : vector<2x8x1xf32> to vector<2x8x8xf32>
    %64 = arith.mulf %59, %63 : vector<2x8x8xf32>
    "tpu.trace_start"() <{level = 10 : i32, message = "bqk,bke->bqe"}> : () -> ()
    %cst_22 = arith.constant dense<0.000000e+00> : vector<2x8x32xf32>
    %65 = tpu.matmul %64, %53, %cst_22 {dimension_numbers = #tpu.dot_dimension_numbers<[2], [1], [1], [2], [0, 0, 0, 1, 1, 2], [0], [0]>} : vector<2x8x8xf32>, vector<2x8x32xf32>, vector<2x8x32xf32> -> vector<2x8x32xf32>
    "tpu.trace_stop"() : () -> ()
    %66 = vector.shape_cast %65 : vector<2x8x32xf32> to vector<16x32xf32>
    %c64 = arith.constant 64 : index
    %c0_23 = arith.constant 0 : index
    %67 = vector.load %arg2[%c64, %c0_23] : memref<128x32xf32, #tpu.memory_space<vmem>>, vector<32x32xf32>
    %cst_24 = arith.constant dense<0.000000e+00> : vector<16x32xf32>
    %68 = tpu.matmul %66, %67, %cst_24 {dimension_numbers = #tpu.dot_dimension_numbers<[1], [0], [0], [1], [0, 0, 1, 1], [], []>} : vector<16x32xf32>, vector<32x32xf32>, vector<16x32xf32> -> vector<16x32xf32>
    %69 = arith.addf %50, %68 : vector<16x32xf32>
    %70 = vector.extract_strided_slice %9 {offsets = [0, 0, 96], sizes = [2, 8, 32], strides = [1, 1, 1]} : vector<2x8x128xf32> to vector<2x8x32xf32>
    %71 = vector.extract_strided_slice %10 {offsets = [0, 0, 96], sizes = [2, 8, 32], strides = [1, 1, 1]} : vector<2x8x128xf32> to vector<2x8x32xf32>
    %72 = vector.extract_strided_slice %11 {offsets = [0, 0, 96], sizes = [2, 8, 32], strides = [1, 1, 1]} : vector<2x8x128xf32> to vector<2x8x32xf32>
    "tpu.trace_start"() <{level = 10 : i32, message = "bqe,bke->bqk"}> : () -> ()
    %cst_25 = arith.constant dense<0.000000e+00> : vector<2x8x8xf32>
    %73 = tpu.matmul %70, %71, %cst_25 {dimension_numbers = #tpu.dot_dimension_numbers<[2], [2], [1], [1], [0, 0, 0, 1, 1, 1], [0], [0]>} : vector<2x8x32xf32>, vector<2x8x32xf32>, vector<2x8x8xf32> -> vector<2x8x8xf32>
    "tpu.trace_stop"() : () -> ()
    %cst_26 = arith.constant dense<0xFF800000> : vector<2x8xf32>
    %74 = vector.multi_reduction <maximumf>, %73, %cst_26 [2] : vector<2x8x8xf32> to vector<2x8xf32>
    %75 = vector.shape_cast %74 : vector<2x8xf32> to vector<2x8x1xf32>
    %76 = vector.broadcast %75 : vector<2x8x1xf32> to vector<2x8x8xf32>
    %77 = arith.subf %73, %76 : vector<2x8x8xf32>
    %78 = math.exp %77 : vector<2x8x8xf32>
    %cst_27 = arith.constant dense<0.000000e+00> : vector<2x8xf32>
    %79 = vector.multi_reduction <add>, %78, %cst_27 [2] : vector<2x8x8xf32> to vector<2x8xf32>
    %80 = vector.shape_cast %79 : vector<2x8xf32> to vector<2x8x1xf32>
    %81 = tpu.reciprocal %80 : vector<2x8x1xf32> -> vector<2x8x1xf32>
    %82 = vector.broadcast %81 : vector<2x8x1xf32> to vector<2x8x8xf32>
    %83 = arith.mulf %78, %82 : vector<2x8x8xf32>
    "tpu.trace_start"() <{level = 10 : i32, message = "bqk,bke->bqe"}> : () -> ()
    %cst_28 = arith.constant dense<0.000000e+00> : vector<2x8x32xf32>
    %84 = tpu.matmul %83, %72, %cst_28 {dimension_numbers = #tpu.dot_dimension_numbers<[2], [1], [1], [2], [0, 0, 0, 1, 1, 2], [0], [0]>} : vector<2x8x8xf32>, vector<2x8x32xf32>, vector<2x8x32xf32> -> vector<2x8x32xf32>
    "tpu.trace_stop"() : () -> ()
    %85 = vector.shape_cast %84 : vector<2x8x32xf32> to vector<16x32xf32>
    %c96 = arith.constant 96 : index
    %c0_29 = arith.constant 0 : index
    %86 = vector.load %arg2[%c96, %c0_29] : memref<128x32xf32, #tpu.memory_space<vmem>>, vector<32x32xf32>
    %cst_30 = arith.constant dense<0.000000e+00> : vector<16x32xf32>
    %87 = tpu.matmul %85, %86, %cst_30 {dimension_numbers = #tpu.dot_dimension_numbers<[1], [0], [0], [1], [0, 0, 1, 1], [], []>} : vector<16x32xf32>, vector<32x32xf32>, vector<16x32xf32> -> vector<16x32xf32>
    %88 = arith.addf %69, %87 : vector<16x32xf32>
    %c0_31 = arith.constant 0 : index
    %c0_32 = arith.constant 0 : index
    %89 = vector.load %arg6[%c0_31, %c0_32] : memref<6x32xf32, #tpu.memory_space<vmem>>, vector<1x32xf32>
    %90 = vector.broadcast %89 : vector<1x32xf32> to vector<16x32xf32>
    %91 = arith.addf %88, %90 : vector<16x32xf32>
    %92 = arith.addf %91, %1 : vector<16x32xf32>
    %c1 = arith.constant 1 : index
    %c0_33 = arith.constant 0 : index
    %93 = vector.load %arg6[%c1, %c0_33] : memref<6x32xf32, #tpu.memory_space<vmem>>, vector<1x32xf32>
    %c2 = arith.constant 2 : index
    %c0_34 = arith.constant 0 : index
    %94 = vector.load %arg6[%c2, %c0_34] : memref<6x32xf32, #tpu.memory_space<vmem>>, vector<1x32xf32>
    %cst_35 = arith.constant dense<0.000000e+00> : vector<16xf32>
    %95 = vector.multi_reduction <add>, %92, %cst_35 [1] : vector<16x32xf32> to vector<16xf32>
    %96 = vector.shape_cast %95 : vector<16xf32> to vector<16x1xf32>
    %cst_36 = arith.constant 3.200000e+01 : f32
    %97 = vector.broadcast %cst_36 : f32 to vector<16x1xf32>
    %98 = arith.divf %96, %97 : vector<16x1xf32>
    %99 = vector.broadcast %98 : vector<16x1xf32> to vector<16x32xf32>
    %100 = arith.subf %92, %99 : vector<16x32xf32>
    %101 = arith.mulf %100, %100 : vector<16x32xf32>
    %cst_37 = arith.constant dense<0.000000e+00> : vector<16xf32>
    %102 = vector.multi_reduction <add>, %101, %cst_37 [1] : vector<16x32xf32> to vector<16xf32>
    %103 = vector.shape_cast %102 : vector<16xf32> to vector<16x1xf32>
    %cst_38 = arith.constant 3.200000e+01 : f32
    %104 = vector.broadcast %cst_38 : f32 to vector<16x1xf32>
    %105 = arith.divf %103, %104 : vector<16x1xf32>
    %cst_39 = arith.constant 9.99999974E-6 : f32
    %106 = vector.broadcast %cst_39 : f32 to vector<16x1xf32>
    %107 = arith.addf %105, %106 : vector<16x1xf32>
    %108 = math.rsqrt %107 : vector<16x1xf32>
    %109 = vector.broadcast %108 : vector<16x1xf32> to vector<16x32xf32>
    %110 = arith.mulf %100, %109 : vector<16x32xf32>
    %111 = vector.broadcast %93 : vector<1x32xf32> to vector<16x32xf32>
    %112 = arith.mulf %110, %111 : vector<16x32xf32>
    %113 = vector.broadcast %94 : vector<1x32xf32> to vector<16x32xf32>
    %114 = arith.addf %112, %113 : vector<16x32xf32>
    %c0_40 = arith.constant 0 : index
    %c0_41 = arith.constant 0 : index
    %115 = vector.load %arg3[%c0_40, %c0_41] : memref<32x128xf32, #tpu.memory_space<vmem>>, vector<32x128xf32>
    %cst_42 = arith.constant dense<0.000000e+00> : vector<16x128xf32>
    %116 = tpu.matmul %114, %115, %cst_42 {dimension_numbers = #tpu.dot_dimension_numbers<[1], [0], [0], [1], [0, 0, 1, 1], [], []>} : vector<16x32xf32>, vector<32x128xf32>, vector<16x128xf32> -> vector<16x128xf32>
    %c0_43 = arith.constant 0 : index
    %c0_44 = arith.constant 0 : index
    %117 = vector.load %arg5[%c0_43, %c0_44] : memref<1x128xf32, #tpu.memory_space<vmem>>, vector<1x128xf32>
    %118 = vector.broadcast %117 : vector<1x128xf32> to vector<16x128xf32>
    %119 = arith.addf %116, %118 : vector<16x128xf32>
    %cst_45 = arith.constant 0.000000e+00 : f32
    %120 = vector.broadcast %cst_45 : f32 to vector<16x128xf32>
    %121 = arith.maximumf %119, %120 : vector<16x128xf32>
    %c0_46 = arith.constant 0 : index
    %c0_47 = arith.constant 0 : index
    %122 = vector.load %arg4[%c0_46, %c0_47] : memref<128x32xf32, #tpu.memory_space<vmem>>, vector<128x32xf32>
    %cst_48 = arith.constant dense<0.000000e+00> : vector<16x32xf32>
    %123 = tpu.matmul %121, %122, %cst_48 {dimension_numbers = #tpu.dot_dimension_numbers<[1], [0], [0], [1], [0, 0, 1, 1], [], []>} : vector<16x128xf32>, vector<128x32xf32>, vector<16x32xf32> -> vector<16x32xf32>
    %c3 = arith.constant 3 : index
    %c0_49 = arith.constant 0 : index
    %124 = vector.load %arg6[%c3, %c0_49] : memref<6x32xf32, #tpu.memory_space<vmem>>, vector<1x32xf32>
    %125 = vector.broadcast %124 : vector<1x32xf32> to vector<16x32xf32>
    %126 = arith.addf %123, %125 : vector<16x32xf32>
    %127 = arith.addf %126, %114 : vector<16x32xf32>
    %c4 = arith.constant 4 : index
    %c0_50 = arith.constant 0 : index
    %128 = vector.load %arg6[%c4, %c0_50] : memref<6x32xf32, #tpu.memory_space<vmem>>, vector<1x32xf32>
    %c5 = arith.constant 5 : index
    %c0_51 = arith.constant 0 : index
    %129 = vector.load %arg6[%c5, %c0_51] : memref<6x32xf32, #tpu.memory_space<vmem>>, vector<1x32xf32>
    %cst_52 = arith.constant dense<0.000000e+00> : vector<16xf32>
    %130 = vector.multi_reduction <add>, %127, %cst_52 [1] : vector<16x32xf32> to vector<16xf32>
    %131 = vector.shape_cast %130 : vector<16xf32> to vector<16x1xf32>
    %cst_53 = arith.constant 3.200000e+01 : f32
    %132 = vector.broadcast %cst_53 : f32 to vector<16x1xf32>
    %133 = arith.divf %131, %132 : vector<16x1xf32>
    %134 = vector.broadcast %133 : vector<16x1xf32> to vector<16x32xf32>
    %135 = arith.subf %127, %134 : vector<16x32xf32>
    %136 = arith.mulf %135, %135 : vector<16x32xf32>
    %cst_54 = arith.constant dense<0.000000e+00> : vector<16xf32>
    %137 = vector.multi_reduction <add>, %136, %cst_54 [1] : vector<16x32xf32> to vector<16xf32>
    %138 = vector.shape_cast %137 : vector<16xf32> to vector<16x1xf32>
    %cst_55 = arith.constant 3.200000e+01 : f32
    %139 = vector.broadcast %cst_55 : f32 to vector<16x1xf32>
    %140 = arith.divf %138, %139 : vector<16x1xf32>
    %cst_56 = arith.constant 9.99999974E-6 : f32
    %141 = vector.broadcast %cst_56 : f32 to vector<16x1xf32>
    %142 = arith.addf %140, %141 : vector<16x1xf32>
    %143 = math.rsqrt %142 : vector<16x1xf32>
    %144 = vector.broadcast %143 : vector<16x1xf32> to vector<16x32xf32>
    %145 = arith.mulf %135, %144 : vector<16x32xf32>
    %146 = vector.broadcast %128 : vector<1x32xf32> to vector<16x32xf32>
    %147 = arith.mulf %145, %146 : vector<16x32xf32>
    %148 = vector.broadcast %129 : vector<1x32xf32> to vector<16x32xf32>
    %149 = arith.addf %147, %148 : vector<16x32xf32>
    %150 = vector.shape_cast %149 : vector<16x32xf32> to vector<2x8x32xf32>
    %c0_57 = arith.constant 0 : index
    %c0_58 = arith.constant 0 : index
    %c0_59 = arith.constant 0 : index
    %151 = vector.load %arg7[%c0_57, %c0_58, %c0_59] : memref<2x8x32xf32, #tpu.memory_space<vmem>>, vector<2x8x32xf32>
    tpu.vector_store %arg7[%c0_57, %c0_58, %c0_59], %150 {strides = array<i32>} : memref<2x8x32xf32, #tpu.memory_space<vmem>>, vector<2x8x32xf32>,
    return
  }
}

</mosaic_0001>

<bundles_post_ra>
// kernel: tpu_custom_call.1
= control target key start
LH: loop header
LB: loop body
LE: loop exit
PB: predicated region body
PF: predicated region fallthrough
CT: control target
= control target key end

     0   :  { %vm41_vm0 = vcmask 261120   ;;  %s1595_s0 = inlined_call_operand.vmem [shape: f32[2,8,32], index: 0, kind: input, shape index: {}]   ;;  %s1596_s1 = inlined_call_operand.vmem [shape: f32[32,384], index: 1, kind: input, shape index: {}]   ;;  %s1597_s2 = inlined_call_operand.vmem [shape: f32[128,32], index: 2, kind: input, shape index: {}]   ;;  %s1598_s3 = inlined_call_operand.vmem [shape: f32[32,128], index: 3, kind: input, shape index: {}]   ;;  %s1599_s4 = inlined_call_operand.vmem [shape: f32[128,32], index: 4, kind: input, shape index: {}]   ;;  %s1600_s5 = inlined_call_operand.vmem [shape: f32[1,128], index: 5, kind: input, shape index: {}]   ;;  %s1601_s6 = inlined_call_operand.vmem [shape: f32[6,32], index: 6, kind: input, shape index: {}]   ;;  %s1602_s7 = inlined_call_operand.hbm [shape: f32[2,8,32], index: 7, kind: output, shape index: {}]  }
   0x1   :  { %v39_v0 = vld [vmem:[%s1596_s1 + $0x50] sm:$0xff]  ;;  %v36_v1 = vld [vmem:[%s1596_s1 + $0x38] sm:$0xff]  ;;  %v38_v2 = vld [vmem:[%s1596_s1 + $0x48] sm:$0xff] }
   0x2   :  { %83 = vmatpush.msra.mxu2 %v39_v0  ;;  %v33_v3 = vld [vmem:[%s1596_s1 + $0x20] sm:$0xff]  ;;  %60 = vmatpush.msra.mxu0 %v38_v2  ;;  %v35_v4 = vld [vmem:[%s1596_s1 + $0x30] sm:$0xff]  ;;  %v30_v5 = vld [vmem:[%s1596_s1 + $0x8] sm:$0xff] }
   0x3   :  { %v1286_v6 = vld [vmem:[%s1595_s0] sm:$0xff]  ;;  %v32_v7 = vld [vmem:[%s1596_s1 + $0x18] sm:$0xff] }
   0x4   :  { %84 = vmatpush.msra.mxu2 %v36_v1  ;;  %61 = vmatpush.msra.mxu0 %v35_v4  ;;  %v29_v8 = vld [vmem:[%s1596_s1] sm:$0xff]  ;;  %v40_v9 = vld [vmem:[%s1596_s1 + $0x58] sm:$0xff] }
   0x6   :  { %85 = vmatpush.msra.mxu2 %v33_v3  ;;  %62 = vmatpush.msra.mxu0 %v32_v7 }
   0x7   :  { %12 = vsyncpa [#allocation3], 0  ;;  %v37_v10 = vld [vmem:[%s1596_s1 + $0x40] sm:$0xff]  ;;  %v34_v11 = vld [vmem:[%s1596_s1 + $0x28] sm:$0xff]  ;;  %vm171_vm1 = vcmask 64512   ;;  %s1220_s22 = smov 32  }
   0x8   :  { %86 = vmatpush.msra.mxu2 %v30_v5  ;;  %63 = vmatpush.msra.mxu0 %v29_v8  ;;  %v31_v12 = vld [vmem:[%s1596_s1 + $0x10] sm:$0xff]  ;;  %v1313_v13 = vld [vmem:[%s1595_s0 + $0x8] sm:$0xff]  ;;  %s1218_s0 = smov 96   ;;  %s1219_s1 = smov 64   ;;  %v269_v61 = vld [vmem:[%s1597_s2 + $0x18] sm:$0xff] }
   0x9   :  { %1093 = vmatmul.msk.f32.vlgmr.msra.gmra.mxu2 %vm41_vm0, %v1286_v6  ;;  %1091 = vmatmul.msk.f32.vlgmr.msra.gmra.mxu0 %vm41_vm0, %v1286_v6  ;;  %v268_v62 = vld [vmem:[%s1597_s2 + $0x10] sm:$0xff]  ;;  %v267_v63 = vld [vmem:[%s1597_s2 + $0x8] sm:$0xff]  ;;  %v266_v1 = vld [vmem:[%s1597_s2] sm:$0xff]  ;;  %s1222_s12 = smov [#allocation2]   ;;  %s1224_s16 = smov 8  }
   0xa   :  { %106 = vmatpush.msrb.mxu2 %v40_v9  ;;  %s1077_s13 = sshll.u32 %s1222_s12, 4  ;;  %s1078_s13 = int_to_ptr.vmem [resolvable:$true] %s1077_s13 }
   0xc   :  { %107 = vmatpush.msrb.mxu2 %v37_v10 }
   0xe   :  { %108 = vmatpush.msrb.mxu2 %v34_v11 }
  0x10   :  { %109 = vmatpush.msrb.mxu2 %v31_v12 }
  0x11   :  { %1094 = vmatmul.msk.f32.gmra.mxu2 %vm41_vm0, %v1313_v13  ;;  %1092 = vmatmul.msk.f32.gmra.mxu0 %vm41_vm0, %v1313_v13 }
  0x19   :  { %1095 = vmatmul.msk.f32.vlgmr.msrb.gmra.mxu2 %vm41_vm0, %v1286_v6 }
  0x21   :  { %1096 = vmatmul.msk.f32.gmra.mxu2 %vm41_vm0, %v1313_v13 }
  0x86   :  { %v65_v14 = vpop.f32.mrf.mxu0 }
  0x87   :  { %v1325_v16 = vmul.f32 0.17677669, %v65_v14 }
  0x8c   :  { %v1323_v15 = vpop.f32.mrf.mxu2 }
  0x8d   :  { %272 = vrot.lane.b32.xlu0 %v1323_v15, %s1218_s0  ;;  %1097 = vmatpush.xpose.msk.msra.mxu3 %vm41_vm0, %v1323_v15 }
  0x8e   :  { %v68_v20 = vpop.f32.mrf.mxu0 }
  0x8f   :  { %v1349_v21 = vmul.f32 0.17677669, %v68_v20 }
  0x90   :  { %1098 = vmatmul.msk.f32.vlgmr.msra.gmra.mxu3 %vm41_vm0, %v1325_v16 }
  0x94   :  { %v1333_v17 = vpop.f32.mrf.mxu2 }
  0x95   :  { %270 = vrot.lane.b32.xlu0 %v1325_v16, %s1218_s0  ;;  %1099 = vmatpush.xpose.msk.msrb.mxu3 %vm41_vm0, %v1333_v17 }
  0x98   :  { %1100 = vmatmul.msk.f32.vlgmr.msrb.gmra.mxu3 %vm41_vm0, %v1349_v21 }
  0x9c   :  { %v1339_v18 = vpop.f32.mrf.mxu2 }
  0x9d   :  { %375 = vrot.lane.b32.xlu0 %v1339_v18, %s1218_s0  ;;  %238 = vmatpush.msra.mxu3 %v1339_v18 }
  0xa4   :  { %v1360_v35 = vpop.f32.mrf.mxu2 }
  0xa5   :  { %492 = vrot.lane.b32.xlu0 %v1323_v15, %s1219_s1  ;;  %261 = vmatpush.msrb.mxu0 %v1360_v35 }
  0xad   :  { %490 = vrot.lane.b32.xlu0 %v1325_v16, %s1219_s1 }
  0xff   :  { %v273_v19 = vpop.permute.xlu0 %272 }
 0x100   :  { %1103 = vmatpush.xpose.msk.msra.mxu1 %vm41_vm0, %v273_v19 }
 0x107   :  { %v271_v22 = vpop.permute.xlu0 %270 }
 0x108   :  { %1104 = vmatmul.msk.f32.vlgmr.msra.gmra.mxu1 %vm41_vm0, %v271_v22 }
 0x10f   :  { %v376_v23 = vpop.permute.xlu0 %375 }
 0x110   :  { %396 = vmatpush.msrb.mxu3 %v376_v23 }
 0x113   :  { %v142_v24 = vpop.f32.mrf.mxu3 }
 0x114   :  { %v172_v25 = vsel %vm171_vm1, %v142_v24, -inf }
 0x115   :  { %173 = vmax.xlane.f32.xlu1 %v172_v25 }
 0x117   :  { %v493_v53 = vpop.permute.xlu0 %492 }
 0x11b   :  { %v168_v27 = vpop.f32.mrf.mxu3 }
 0x11c   :  { %v175_v29 = vsel %vm171_vm1, %v168_v27, -inf }
 0x11d   :  { %176 = vmax.xlane.f32.xlu0 %v175_v29 }
 0x11f   :  { %v491_v54 = vpop.permute.xlu0 %490 }
 0x185   :  { %v295_v26 = vpop.f32.mrf.mxu1 }
 0x186   :  { %v326_v28 = vsel %vm171_vm1, %v295_v26, -inf }
 0x187   :  { %327 = vmax.xlane.f32.xlu1 %v326_v28 }
 0x188   :  { %v174_v30 = vpop.xlane.xlu1 %173 }
 0x189   :  { %v178_v31 = vsub.f32 %v142_v24, %v174_v30 }
 0x18b   :  { %v180_v32 = vmul.f32 1.442695, %v178_v31 }
 0x18d   :  { %1150 = vpow2.f32 %v180_v32 }
 0x190   :  { %v177_v55 = vpop.xlane.xlu0 %176 }
 0x191   :  { %v179_v56 = vsub.f32 %v168_v27, %v177_v55 }
 0x193   :  { %v1151_v33 = vpop.eup %1150  ;;  %v182_v57 = vmul.f32 1.442695, %v179_v56 }
 0x194   :  { %v184_v34 = vsel %vm171_vm1, %v1151_v33, 0.0 }
 0x195   :  { %185 = vadd.xlane.f32.xlu2 %v184_v34  ;;  %v431_v34 = vld [vmem:[%s1597_s2 + $0x38] sm:$0xff] }
 0x196   :  { %450 = vmatpush.msrb.mxu1 %v431_v34 }
 0x1a0   :  { %300 = vrot.lane.b32.xlu1 %v1333_v17, %s1218_s0 }
 0x1fa   :  { %v328_v36 = vpop.xlane.xlu1 %327 }
 0x1fb   :  { %v332_v37 = vsub.f32 %v295_v26, %v328_v36  ;;  %v430_v36 = vld [vmem:[%s1597_s2 + $0x30] sm:$0xff] }
 0x1fc   :  { %451 = vmatpush.msrb.mxu1 %v430_v36 }
 0x1fd   :  { %v334_v38 = vmul.f32 1.442695, %v332_v37  ;;  %v429_v37 = vld [vmem:[%s1597_s2 + $0x28] sm:$0xff] }
 0x1fe   :  { %452 = vmatpush.msrb.mxu1 %v429_v37 }
 0x1ff   :  { %1152 = vpow2.f32 %v334_v38  ;;  %v428_v38 = vld [vmem:[%s1597_s2 + $0x20] sm:$0xff] }
 0x200   :  { %453 = vmatpush.msrb.mxu1 %v428_v38 }
 0x205   :  { %v1153_v39 = vpop.eup %1152 }
 0x206   :  { %v338_v40 = vsel %vm171_vm1, %v1153_v39, 0.0 }
 0x207   :  { %339 = vadd.xlane.f32.xlu2 %v338_v40 }
 0x208   :  { %v186_v41 = vpop.xlane.xlu2 %185 }
 0x209   :  { %1154 = vrcp.f32 %v186_v41  ;;  %v201_v45 = vand.u32 2147483648, %v186_v41  ;;  %v199_v47 = vand.u32 2147483647, %v186_v41  ;;  %vm195_vm3 = vweird.f32 %v186_v41 }
 0x20a   :  { %1156 = vpow2.f32 %v182_v57 }
 0x20b   :  { %v202_v49 = vor.u32 1.1754944e-38, %v201_v45  ;;  %vm200_vm5 = vcmp.eq.f32.partialorder %v199_v47, 8.507059e+37 }
 0x20f   :  { %v1155_v42 = vpop.eup %1154 }
 0x210   :  { %v191_v43 = vmul.f32 %v1155_v42, %v186_v41  ;;  %vm196_vm2 = vweird.f32 %v1155_v42  ;;  %v1157_v58 = vpop.eup %1156 }
 0x211   :  { %vm197_vm4 = vmor %vm195_vm3, %vm196_vm2  ;;  %v187_v59 = vsel %vm171_vm1, %v1157_v58, 0.0 }
 0x212   :  { %v192_v44 = vsub.f32 1.0, %v191_v43  ;;  %v301_v60 = vpop.permute.xlu1 %300 }
 0x213   :  { %1105 = vmatpush.xpose.msk.msra.mxu2 %vm41_vm0, %v301_v60 }
 0x214   :  { %v193_v46 = vmul.f32 %v1155_v42, %v192_v44 }
 0x216   :  { %v194_v48 = vadd.f32 %v1155_v42, %v193_v46 }
 0x217   :  { %479 = vmatpush.msrb.mxu2 %v269_v61 }
 0x218   :  { %v198_v50 = vsel %vm197_vm4, %v1155_v42, %v194_v48 }
 0x219   :  { %v203_v51 = vsel %vm200_vm5, %v202_v49, %v198_v50  ;;  %480 = vmatpush.msrb.mxu2 %v268_v62 }
 0x21a   :  { %v218_v52 = vmul.f32 %v1151_v33, %v203_v51 }
 0x21b   :  { %481 = vmatpush.msrb.mxu2 %v267_v63 }
 0x21c   :  { %1101 = vmatmul.msk.f32.vlgmr.msra.gmra.mxu3 %vm171_vm1, %v218_v52 }
 0x21d   :  { %1113 = vmatpush.xpose.msk.msra.mxu3 %vm41_vm0, %v493_v53  ;;  %482 = vmatpush.msrb.mxu2 %v266_v1 }
 0x21f   :  { %298 = vrot.lane.b32.xlu2 %v1349_v21, %s1218_s0 }
 0x248   :  { %188 = vadd.xlane.f32.xlu2 %v187_v59 }
 0x27a   :  { %v340_v0 = vpop.xlane.xlu2 %339 }
 0x27b   :  { %1158 = vrcp.f32 %v340_v0  ;;  %v355_v7 = vand.u32 2147483648, %v340_v0  ;;  %v353_v9 = vand.u32 2147483647, %v340_v0  ;;  %vm349_vm7 = vweird.f32 %v340_v0 }
 0x27d   :  { %v356_v11 = vor.u32 1.1754944e-38, %v355_v7  ;;  %vm354_vm9 = vcmp.eq.f32.partialorder %v353_v9, 8.507059e+37 }
 0x281   :  { %v1159_v2 = vpop.eup %1158 }
 0x282   :  { %v345_v3 = vmul.f32 %v1159_v2, %v340_v0  ;;  %v299_v4 = vpop.permute.xlu2 %298  ;;  %vm350_vm6 = vweird.f32 %v1159_v2 }
 0x283   :  { %1106 = vmatmul.msk.f32.vlgmr.msra.gmra.mxu2 %vm41_vm0, %v299_v4  ;;  %vm351_vm8 = vmor %vm349_vm7, %vm350_vm6 }
 0x284   :  { %v346_v5 = vsub.f32 1.0, %v345_v3 }
 0x286   :  { %v347_v8 = vmul.f32 %v1159_v2, %v346_v5 }
 0x288   :  { %v348_v10 = vadd.f32 %v1159_v2, %v347_v8 }
 0x28a   :  { %v352_v12 = vsel %vm351_vm8, %v1159_v2, %v348_v10 }
 0x28b   :  { %v357_v14 = vsel %vm354_vm9, %v356_v11, %v352_v12 }
 0x28c   :  { %v372_v19 = vmul.f32 %v1153_v39, %v357_v14 }
 0x28e   :  { %1107 = vmatmul.msk.f32.vlgmr.msrb.gmra.mxu3 %vm171_vm1, %v372_v19 }
 0x296   :  { %1114 = vmatmul.msk.f32.vlgmr.msra.gmra.mxu3 %vm41_vm0, %v491_v54 }
 0x29f   :  { %v240_v20 = vpop.f32.mrf.mxu3 }
 0x2a0   :  { %1111 = vmatmul.msk.f32.vlgmr.msrb.gmra.mxu2 %vm41_vm0, %v240_v20 }
 0x2bb   :  { %v189_v22 = vpop.xlane.xlu2 %188 }
 0x2bc   :  { %1160 = vrcp.f32 %v189_v22  ;;  %v215_v25 = vand.u32 2147483648, %v189_v22  ;;  %vm209_vm10 = vweird.f32 %v189_v22  ;;  %v213_v27 = vand.u32 2147483647, %v189_v22 }
 0x2be   :  { %v216_v29 = vor.u32 1.1754944e-38, %v215_v25  ;;  %vm214_vm13 = vcmp.eq.f32.partialorder %v213_v27, 8.507059e+37  ;;  %v648_v27 = vld [vmem:[%s1597_s2 + $0x50] sm:$0xff] }
 0x2c2   :  { %v1161_v23 = vpop.eup %1160 }
 0x2c3   :  { %v205_v24 = vmul.f32 %v1161_v23, %v189_v22  ;;  %vm210_vm11 = vweird.f32 %v1161_v23 }
 0x2c4   :  { %vm211_vm12 = vmor %vm209_vm10, %vm210_vm11 }
 0x2c5   :  { %v206_v26 = vsub.f32 1.0, %v205_v24 }
 0x2c7   :  { %v207_v28 = vmul.f32 %v1161_v23, %v206_v26  ;;  %v649_v26 = vld [vmem:[%s1597_s2 + $0x58] sm:$0xff] }
 0x2c8   :  { %668 = vmatpush.msra.mxu1 %v649_v26 }
 0x2c9   :  { %v208_v30 = vadd.f32 %v1161_v23, %v207_v28  ;;  %v647_v28 = vld [vmem:[%s1597_s2 + $0x48] sm:$0xff] }
 0x2ca   :  { %669 = vmatpush.msra.mxu1 %v648_v27 }
 0x2cb   :  { %v212_v31 = vsel %vm211_vm12, %v1161_v23, %v208_v30 }
 0x2cc   :  { %v217_v32 = vsel %vm214_vm13, %v216_v29, %v212_v31  ;;  %670 = vmatpush.msra.mxu1 %v647_v28  ;;  %v646_v29 = vld [vmem:[%s1597_s2 + $0x40] sm:$0xff] }
 0x2cd   :  { %v219_v33 = vmul.f32 %v1157_v58, %v217_v32 }
 0x2ce   :  { %671 = vmatpush.msra.mxu1 %v646_v29 }
 0x2cf   :  { %1102 = vmatmul.msk.f32.vlgmr.msrb.gmra.mxu0 %vm171_vm1, %v219_v33 }
 0x306   :  { %v323_v39 = vpop.f32.mrf.mxu2 }
 0x307   :  { %v329_v40 = vsel %vm171_vm1, %v323_v39, -inf }
 0x308   :  { %330 = vmax.xlane.f32.xlu1 %v329_v40 }
 0x311   :  { %v398_v41 = vpop.f32.mrf.mxu3 }
 0x312   :  { %1109 = vmatmul.msk.f32.vlgmr.msrb.gmra.mxu1 %vm41_vm0, %v398_v41 }
 0x319   :  { %v515_v42 = vpop.f32.mrf.mxu3 }
 0x31a   :  { %v546_v43 = vsel %vm171_vm1, %v515_v42, -inf }
 0x31b   :  { %547 = vmax.xlane.f32.xlu2 %v546_v43 }
 0x321   :  { %520 = vrot.lane.b32.xlu1 %v1333_v17, %s1219_s1 }
 0x323   :  { %v1442_v31 = vpop.f32.mrf.mxu2 }
 0x333   :  { %402 = vrot.lane.b32.xlu2 %v1360_v35, %s1218_s0 }
 0x33b   :  { %518 = vrot.lane.b32.xlu2 %v1349_v21, %s1219_s1 }
 0x343   :  { %709 = vrot.lane.b32.xlu2 %v1349_v21, %s1220_s22 }
 0x34c   :  { %v263_v44 = vpop.f32.mrf.mxu0 }
 0x34d   :  { %1112 = vmatmul.msk.f32.gmra.mxu2 %vm41_vm0, %v263_v44 }
 0x37b   :  { %v331_v45 = vpop.xlane.xlu1 %330 }
 0x37c   :  { %v333_v46 = vsub.f32 %v323_v39, %v331_v45 }
 0x37e   :  { %v336_v47 = vmul.f32 1.442695, %v333_v46 }
 0x380   :  { %1162 = vpow2.f32 %v336_v47 }
 0x386   :  { %v1163_v48 = vpop.eup %1162 }
 0x387   :  { %v341_v49 = vsel %vm171_vm1, %v1163_v48, 0.0 }
 0x388   :  { %342 = vadd.xlane.f32.xlu0 %v341_v49 }
 0x38e   :  { %v548_v50 = vpop.xlane.xlu2 %547 }
 0x38f   :  { %v552_v51 = vsub.f32 %v515_v42, %v548_v50 }
 0x391   :  { %v554_v52 = vmul.f32 1.442695, %v552_v51 }
 0x393   :  { %1164 = vpow2.f32 %v554_v52  ;;  %v521_v54 = vpop.permute.xlu1 %520 }
 0x396   :  { %v403_v53 = vpop.permute.xlu2 %402 }
 0x397   :  { %423 = vmatpush.msra.mxu0 %v403_v53 }
 0x399   :  { %1115 = vmatpush.xpose.msk.msrb.mxu0 %vm41_vm0, %v521_v54  ;;  %v1165_v21 = vpop.eup %1164 }
 0x39a   :  { %v558_v55 = vsel %vm171_vm1, %v1165_v21, 0.0 }
 0x39b   :  { %559 = vadd.xlane.f32.xlu1 %v558_v55  ;;  %v1138_v55 = vpack.i.bf16 %v1360_v35, %v1339_v18 }
 0x39c   :  { %594 = vrot.lane.b32.xlu0 %v1339_v18, %s1219_s1 }
 0x39e   :  { %v519_v4 = vpop.permute.xlu2 %518 }
 0x3a4   :  { %683 = vrot.lane.b32.xlu0 %v1323_v15, %s1220_s22 }
 0x3a6   :  { %v710_v25 = vpop.permute.xlu2 %709 }
 0x3ac   :  { %681 = vrot.lane.b32.xlu0 %v1325_v16, %s1220_s22 }
 0x3b4   :  { %711 = vrot.lane.b32.xlu1 %v1333_v17, %s1220_s22 }
 0x3d0   :  { %v1445_v34 = vpop.f32.mrf.mxu2 }
 0x3fb   :  { %v343_v56 = vpop.xlane.xlu0 %342 }
 0x3fc   :  { %1166 = vrcp.f32 %v343_v56  ;;  %v369_v60 = vand.u32 2147483648, %v343_v56  ;;  %v367_v62 = vand.u32 2147483647, %v343_v56  ;;  %vm363_vm15 = vweird.f32 %v343_v56 }
 0x3fe   :  { %v370_v0 = vor.u32 1.1754944e-38, %v369_v60  ;;  %vm368_vm3 = vcmp.eq.f32.partialorder %v367_v62, 8.507059e+37 }
 0x402   :  { %v1167_v57 = vpop.eup %1166 }
 0x403   :  { %v359_v58 = vmul.f32 %v1167_v57, %v343_v56  ;;  %vm364_vm14 = vweird.f32 %v1167_v57 }
 0x404   :  { %vm365_vm2 = vmor %vm363_vm15, %vm364_vm14 }
 0x405   :  { %v360_v59 = vsub.f32 1.0, %v359_v58 }
 0x407   :  { %v361_v61 = vmul.f32 %v1167_v57, %v360_v59 }
 0x409   :  { %v362_v63 = vadd.f32 %v1167_v57, %v361_v61 }
 0x40b   :  { %v366_v15 = vsel %vm365_vm2, %v1167_v57, %v362_v63 }
 0x40c   :  { %v371_v1 = vsel %vm368_vm3, %v370_v0, %v366_v15 }
 0x40d   :  { %v373_v16 = vmul.f32 %v1163_v48, %v371_v1 }
 0x40e   :  { %v560_v2 = vpop.xlane.xlu1 %559  ;;  %v595_v3 = vpop.permute.xlu0 %594 }
 0x40f   :  { %1168 = vrcp.f32 %v560_v2  ;;  %1108 = vmatmul.msk.f32.vlgmr.msra.gmra.mxu0 %vm171_vm1, %v373_v16  ;;  %615 = vmatpush.msrb.mxu3 %v595_v3  ;;  %v575_v9 = vand.u32 2147483648, %v560_v2  ;;  %v573_v11 = vand.u32 2147483647, %v560_v2  ;;  %vm569_vm5 = vweird.f32 %v560_v2 }
 0x411   :  { %v576_v14 = vor.u32 1.1754944e-38, %v575_v9  ;;  %vm574_vm7 = vcmp.eq.f32.partialorder %v573_v11, 8.507059e+37 }
 0x415   :  { %v1169_v17 = vpop.eup %1168 }
 0x416   :  { %v565_v5 = vmul.f32 %v1169_v17, %v560_v2  ;;  %v684_v7 = vpop.permute.xlu0 %683  ;;  %vm570_vm4 = vweird.f32 %v1169_v17 }
 0x417   :  { %1116 = vmatmul.msk.f32.vlgmr.msrb.gmra.mxu0 %vm41_vm0, %v519_v4  ;;  %1121 = vmatpush.xpose.msk.msra.mxu2 %vm41_vm0, %v684_v7  ;;  %vm571_vm6 = vmor %vm569_vm5, %vm570_vm4 }
 0x418   :  { %v566_v8 = vsub.f32 1.0, %v565_v5 }
 0x41a   :  { %v567_v10 = vmul.f32 %v1169_v17, %v566_v8 }
 0x41c   :  { %v568_v12 = vadd.f32 %v1169_v17, %v567_v10 }
 0x41e   :  { %v572_v19 = vsel %vm571_vm6, %v1169_v17, %v568_v12  ;;  %v682_v20 = vpop.permute.xlu0 %681 }
 0x41f   :  { %v577_v22 = vsel %vm574_vm7, %v576_v14, %v572_v19  ;;  %1122 = vmatmul.msk.f32.vlgmr.msra.gmra.mxu2 %vm41_vm0, %v682_v20 }
 0x420   :  { %v592_v23 = vmul.f32 %v1165_v21, %v577_v22 }
 0x422   :  { %1117 = vmatmul.msk.f32.vlgmr.msrb.gmra.mxu3 %vm171_vm1, %v592_v23 }
 0x426   :  { %v712_v24 = vpop.permute.xlu1 %711 }
 0x427   :  { %1123 = vmatpush.xpose.msk.msra.mxu3 %vm41_vm0, %v712_v24 }
 0x42a   :  { %1124 = vmatmul.msk.f32.vlgmr.msra.gmra.mxu3 %vm41_vm0, %v710_v25 }
 0x48c   :  { %v425_v30 = vpop.f32.mrf.mxu0 }
 0x48d   :  { %1110 = vmatmul.msk.f32.gmra.mxu1 %vm41_vm0, %v425_v30 }
 0x494   :  { %v543_v32 = vpop.f32.mrf.mxu0 }
 0x495   :  { %v549_v33 = vsel %vm171_vm1, %v543_v32, -inf }
 0x496   :  { %550 = vmax.xlane.f32.xlu1 %v549_v33 }
 0x4a2   :  { %v706_v36 = vpop.f32.mrf.mxu2 }
 0x4a3   :  { %v737_v37 = vsel %vm171_vm1, %v706_v36, -inf }
 0x4a4   :  { %738 = vmax.xlane.f32.xlu0 %v737_v37  ;;  %v840_v37 = vld [vmem:[%s1597_s2 + $0x78] sm:$0xff] }
 0x4a5   :  { %v617_v38 = vpop.f32.mrf.mxu3  ;;  %859 = vmatpush.msrb.mxu3 %v840_v37 }
 0x4a6   :  { %1119 = vmatmul.msk.f32.vlgmr.msra.gmra.mxu1 %vm41_vm0, %v617_v38  ;;  %v839_v38 = vld [vmem:[%s1597_s2 + $0x70] sm:$0xff] }
 0x4a7   :  { %860 = vmatpush.msrb.mxu3 %v839_v38  ;;  %v1144_v38 = vld [vmem:[%s1601_s6 + $0x1] ss:$0 sm:$0xff] }
 0x4ad   :  { %v734_v39 = vpop.f32.mrf.mxu3 }
 0x4ae   :  { %v740_v40 = vsel %vm171_vm1, %v734_v39, -inf }
 0x4af   :  { %741 = vmax.xlane.f32.xlu2 %v740_v40  ;;  %v837_v40 = vld [vmem:[%s1597_s2 + $0x60] sm:$0xff] }
 0x509   :  { %v551_v41 = vpop.xlane.xlu1 %550 }
 0x50a   :  { %v553_v42 = vsub.f32 %v543_v32, %v551_v41 }
 0x50c   :  { %v556_v43 = vmul.f32 1.442695, %v553_v42 }
 0x50e   :  { %1170 = vpow2.f32 %v556_v43 }
 0x514   :  { %v1171_v44 = vpop.eup %1170 }
 0x515   :  { %v561_v45 = vsel %vm171_vm1, %v1171_v44, 0.0 }
 0x516   :  { %562 = vadd.xlane.f32.xlu1 %v561_v45 }
 0x517   :  { %v739_v46 = vpop.xlane.xlu0 %738 }
 0x518   :  { %v743_v47 = vsub.f32 %v706_v36, %v739_v46 }
 0x51a   :  { %v745_v48 = vmul.f32 1.442695, %v743_v47 }
 0x51c   :  { %1172 = vpow2.f32 %v745_v48 }
 0x522   :  { %v1173_v49 = vpop.eup %1172  ;;  %v742_v50 = vpop.xlane.xlu2 %741 }
 0x523   :  { %v744_v51 = vsub.f32 %v734_v39, %v742_v50  ;;  %v749_v52 = vsel %vm171_vm1, %v1173_v49, 0.0  ;;  %v838_v39 = vld [vmem:[%s1597_s2 + $0x68] sm:$0xff]  ;;  %s1223_s2 = smov 128  }
 0x524   :  { %750 = vadd.xlane.f32.xlu0 %v749_v52  ;;  %861 = vmatpush.msrb.mxu3 %v838_v39  ;;  %v985_v39 = vld [vmem:[%s1599_s4 + $0x48] sm:$0xff] }
 0x525   :  { %v747_v53 = vmul.f32 1.442695, %v744_v51 }
 0x526   :  { %862 = vmatpush.msrb.mxu3 %v837_v40 }
 0x527   :  { %1174 = vpow2.f32 %v747_v53 }
 0x52d   :  { %v1452_v54 = vpop.eup %1174 }
 0x52e   :  { %v752_v21 = vsel %vm171_vm1, %v1452_v54, 0.0 }
 0x52f   :  { %620 = vrot.lane.b32.xlu1 %v1360_v35, %s1219_s1  ;;  %753 = vadd.xlane.f32.xlu2 %v752_v21 }
 0x538   :  { %1139 = vrot.lane.b32.xlu0 %v1138_v55, %s1220_s22 }
 0x589   :  { %v563_v56 = vpop.xlane.xlu1 %562 }
 0x58a   :  { %1176 = vrcp.f32 %v563_v56  ;;  %v589_v63 = vand.u32 2147483648, %v563_v56  ;;  %vm583_vm9 = vweird.f32 %v563_v56  ;;  %v587_v0 = vand.u32 2147483647, %v563_v56 }
 0x58c   :  { %v590_v1 = vor.u32 1.1754944e-38, %v589_v63  ;;  %vm588_vm11 = vcmp.eq.f32.partialorder %v587_v0, 8.507059e+37 }
 0x590   :  { %v1177_v57 = vpop.eup %1176 }
 0x591   :  { %v579_v58 = vmul.f32 %v1177_v57, %v563_v56  ;;  %vm584_vm8 = vweird.f32 %v1177_v57 }
 0x592   :  { %vm585_vm10 = vmor %vm583_vm9, %vm584_vm8 }
 0x593   :  { %v580_v59 = vsub.f32 1.0, %v579_v58 }
 0x595   :  { %v581_v60 = vmul.f32 %v1177_v57, %v580_v59 }
 0x597   :  { %v582_v61 = vadd.f32 %v1177_v57, %v581_v60  ;;  %v751_v62 = vpop.xlane.xlu0 %750 }
 0x598   :  { %1178 = vrcp.f32 %v751_v62  ;;  %v766_v7 = vand.u32 2147483648, %v751_v62  ;;  %v764_v8 = vand.u32 2147483647, %v751_v62  ;;  %vm760_vm13 = vweird.f32 %v751_v62 }
 0x599   :  { %v586_v15 = vsel %vm585_vm10, %v1177_v57, %v582_v61  ;;  %v1221_v61 = vmov 32.0  }
 0x59a   :  { %v591_v35 = vsel %vm588_vm11, %v590_v1, %v586_v15  ;;  %v767_v11 = vor.u32 1.1754944e-38, %v766_v7  ;;  %vm765_vm15 = vcmp.eq.f32.partialorder %v764_v8, 8.507059e+37  ;;  %v940_v7 = vld [vmem:[%s1598_s3 + $0x18] sm:$0xff]  ;;  %v939_v8 = vld [vmem:[%s1598_s3 + $0x10] sm:$0xff] }
 0x59b   :  { %v593_v17 = vmul.f32 %v1171_v44, %v591_v35  ;;  %v455_v44 = vpop.f32.mrf.mxu1 }
 0x59c   :  { %v485_v47 = vadd.f32 %v1442_v31, %v455_v44 }
 0x59e   :  { %v1179_v18 = vpop.eup %1178 }
 0x59f   :  { %v756_v16 = vmul.f32 %v1179_v18, %v751_v62  ;;  %vm761_vm12 = vweird.f32 %v1179_v18 }
 0x5a0   :  { %vm762_vm14 = vmor %vm760_vm13, %vm761_vm12 }
 0x5a1   :  { %v757_v2 = vsub.f32 1.0, %v756_v16  ;;  %v621_v3 = vpop.permute.xlu1 %620 }
 0x5a2   :  { %641 = vmatpush.msra.mxu0 %v621_v3  ;;  %v754_v4 = vpop.xlane.xlu2 %753 }
 0x5a3   :  { %v758_v5 = vmul.f32 %v1179_v18, %v757_v2  ;;  %1180 = vrcp.f32 %v754_v4  ;;  %1118 = vmatmul.msk.f32.vlgmr.msra.gmra.mxu0 %vm171_vm1, %v593_v17  ;;  %v780_v26 = vand.u32 2147483648, %v754_v4  ;;  %v778_v28 = vand.u32 2147483647, %v754_v4  ;;  %v458_v45 = vpop.f32.mrf.mxu1 }
 0x5a4   :  { %vm774_vm3 = vweird.f32 %v754_v4  ;;  %v488_v55 = vadd.f32 %v1445_v34, %v458_v45  ;;  %1182 = vrcp.f32 %v1221_v61  ;;  %v976_v61 = vld [vmem:[%s1599_s4] sm:$0xff] }
 0x5a5   :  { %v759_v9 = vadd.f32 %v1179_v18, %v758_v5  ;;  %v781_v30 = vor.u32 1.1754944e-38, %v780_v26  ;;  %vm779_vm5 = vcmp.eq.f32.partialorder %v778_v28, 8.507059e+37  ;;  %v988_v28 = vld [vmem:[%s1599_s4 + $0x60] sm:$0xff] }
 0x5a7   :  { %v763_v10 = vsel %vm762_vm14, %v1179_v18, %v759_v9  ;;  %v938_v9 = vld [vmem:[%s1598_s3 + $0x8] sm:$0xff] }
 0x5a8   :  { %v768_v14 = vsel %vm765_vm15, %v767_v11, %v763_v10  ;;  %v937_v10 = vld [vmem:[%s1598_s3] sm:$0xff] }
 0x5a9   :  { %v1181_v12 = vpop.eup %1180  ;;  %v783_v25 = vmul.f32 %v1173_v49, %v768_v14  ;;  %v1143_v49 = vld [vmem:[%s1601_s6] ss:$0 sm:$0xff] }
 0x5aa   :  { %v770_v19 = vmul.f32 %v1181_v12, %v754_v4  ;;  %v1140_v20 = vpop.permute.xlu0 %1139  ;;  %vm775_vm2 = vweird.f32 %v1181_v12  ;;  %v1183_v62 = vpop.eup %1182 }
 0x5ab   :  { %v1142_v22 = vunpack.i.h.bf16 %v1140_v20  ;;  %v1141_v23 = vunpack.i.l.bf16 %v1140_v20  ;;  %vm776_vm4 = vmor %vm774_vm3, %vm775_vm2  ;;  %v673_v46 = vpop.f32.mrf.mxu1  ;;  %v887_v63 = vmul.f32 32.0, %v1183_v62  ;;  %v991_v20 = vld [vmem:[%s1599_s4 + $0x78] sm:$0xff] }
 0x5ac   :  { %v771_v24 = vsub.f32 1.0, %v770_v19  ;;  %v679_v48 = vadd.f32 %v673_v46, %v485_v47  ;;  %994 = vmatpush.msrb.mxu1 %v991_v20  ;;  %v983_v46 = vld [vmem:[%s1599_s4 + $0x38] sm:$0xff] }
 0x5ad   :  { %806 = vmatpush.msrb.mxu0 %v1141_v23  ;;  %832 = vmatpush.msrb.mxu2 %v1142_v22  ;;  %v990_v22 = vld [vmem:[%s1599_s4 + $0x70] sm:$0xff] }
 0x5ae   :  { %v772_v27 = vmul.f32 %v1181_v12, %v771_v24  ;;  %1125 = vmatmul.msk.f32.vlgmr.msrb.gmra.mxu0 %vm171_vm1, %v783_v25  ;;  %v989_v24 = vld [vmem:[%s1599_s4 + $0x68] sm:$0xff]  ;;  %995 = vmatpush.msrb.mxu1 %v990_v22 }
 0x5af   :  { %963 = vmatpush.msra.mxu0 %v940_v7 }
 0x5b0   :  { %v773_v29 = vadd.f32 %v1181_v12, %v772_v27  ;;  %996 = vmatpush.msrb.mxu1 %v989_v24 }
 0x5b1   :  { %964 = vmatpush.msra.mxu0 %v939_v8 }
 0x5b2   :  { %v777_v32 = vsel %vm776_vm4, %v1181_v12, %v773_v29  ;;  %997 = vmatpush.msrb.mxu1 %v988_v28 }
 0x5b3   :  { %v782_v33 = vsel %vm779_vm5, %v781_v30, %v777_v32  ;;  %965 = vmatpush.msra.mxu0 %v938_v9  ;;  %v987_v32 = vld [vmem:[%s1599_s4 + $0x58] sm:$0xff] }
 0x5b4   :  { %v784_v36 = vmul.f32 %v1452_v54, %v782_v33  ;;  %998 = vmatpush.msrb.mxu1 %v987_v32 }
 0x5b5   :  { %966 = vmatpush.msra.mxu0 %v937_v10 }
 0x5b6   :  { %1126 = vmatmul.msk.f32.vlgmr.msrb.gmra.mxu2 %vm171_vm1, %v784_v36  ;;  %vm891_vm1 = vweird.f32 %v1183_v62  ;;  %v986_v36 = vld [vmem:[%s1599_s4 + $0x50] sm:$0xff] }
 0x5b7   :  { %999 = vmatpush.msrb.mxu1 %v986_v36 }
 0x5b9   :  { %1000 = vmatpush.msrb.mxu1 %v985_v39  ;;  %v1148_v39 = vld [vmem:[%s1601_s6 + $0x4] ss:$0 sm:$0xff] }
 0x620   :  { %v643_v41 = vpop.f32.mrf.mxu0 }
 0x621   :  { %1120 = vmatmul.msk.f32.gmra.mxu1 %vm41_vm0, %v643_v41 }
 0x62b   :  { %v808_v42 = vpop.f32.mrf.mxu0 }
 0x62c   :  { %1127 = vmatmul.msk.f32.vlgmr.msrb.gmra.mxu3 %vm41_vm0, %v808_v42  ;;  %v1145_v42 = vld [vmem:[%s1601_s6 + $0x2] ss:$0 sm:$0xff] }
 0x639   :  { %v834_v43 = vpop.f32.mrf.mxu2 }
 0x63a   :  { %1128 = vmatmul.msk.f32.gmra.mxu3 %vm41_vm0, %v834_v43  ;;  %v984_v43 = vld [vmem:[%s1599_s4 + $0x40] sm:$0xff] }
 0x63b   :  { %1001 = vmatpush.msrb.mxu1 %v984_v43 }
 0x63d   :  { %1002 = vmatpush.msrb.mxu1 %v983_v46 }
 0x69e   :  { %v676_v21 = vpop.f32.mrf.mxu1 }
 0x69f   :  { %v680_v56 = vadd.f32 %v676_v21, %v488_v55  ;;  %v979_v21 = vld [vmem:[%s1599_s4 + $0x18] sm:$0xff] }
 0x6af   :  { %v864_v50 = vpop.f32.mrf.mxu3 }
 0x6b0   :  { %v870_v51 = vadd.f32 %v864_v50, %v679_v48 }
 0x6b2   :  { %v874_v52 = vadd.f32 %v1143_v49, %v870_v51  ;;  %v981_v51 = vld [vmem:[%s1599_s4 + $0x28] sm:$0xff] }
 0x6b4   :  { %v876_v53 = vadd.f32 %v874_v52, %v1286_v6  ;;  %v888_v6 = vsub.f32 1.0, %v887_v63 }
 0x6b6   :  { %v880_v54 = vsel %vm41_vm0, %v876_v53, 0.0  ;;  %v889_v0 = vmul.f32 %v1183_v62, %v888_v6 }
 0x6b7   :  { %881 = vadd.xlane.f32.xlu2 %v880_v54 }
 0x6b8   :  { %v890_v15 = vadd.f32 %v1183_v62, %v889_v0 }
 0x6ba   :  { %v1489_v1 = vsel %vm891_vm1, %v1183_v62, %v890_v15  ;;  %v1146_v62 = vld [vmem:[%s1600_s5] ss:$0 sm:$0xff] }
 0x6bd   :  { %v867_v57 = vpop.f32.mrf.mxu3 }
 0x6be   :  { %v871_v58 = vadd.f32 %v867_v57, %v680_v56 }
 0x6c0   :  { %v875_v31 = vadd.f32 %v1143_v49, %v871_v58  ;;  %v982_v49 = vld [vmem:[%s1599_s4 + $0x30] sm:$0xff] }
 0x6c1   :  { %1003 = vmatpush.msrb.mxu1 %v982_v49 }
 0x6c2   :  { %v877_v59 = vadd.f32 %v875_v31, %v1313_v13 }
 0x6c3   :  { %1004 = vmatpush.msrb.mxu1 %v981_v51 }
 0x6c4   :  { %v883_v60 = vsel %vm41_vm0, %v877_v59, 0.0 }
 0x6c5   :  { %884 = vadd.xlane.f32.xlu2 %v883_v60  ;;  %v977_v60 = vld [vmem:[%s1599_s4 + $0x8] sm:$0xff] }
 0x72a   :  { %v882_v34 = vpop.xlane.xlu2 %881 }
 0x72b   :  { %v893_v18 = vmul.f32 %v1489_v1, %v882_v34 }
 0x72d   :  { %v895_v35 = vsub.f32 %v876_v53, %v893_v18  ;;  %v980_v53 = vld [vmem:[%s1599_s4 + $0x20] sm:$0xff] }
 0x72e   :  { %1005 = vmatpush.msrb.mxu1 %v980_v53 }
 0x72f   :  { %v897_v16 = vmul.f32 %v895_v35, %v895_v35 }
 0x730   :  { %1006 = vmatpush.msrb.mxu1 %v979_v21 }
 0x731   :  { %v899_v13 = vsel %vm41_vm0, %v897_v16, 0.0 }
 0x732   :  { %900 = vadd.xlane.f32.xlu2 %v899_v13 }
 0x738   :  { %v885_v2 = vpop.xlane.xlu2 %884 }
 0x739   :  { %v894_v3 = vmul.f32 %v1489_v1, %v885_v2 }
 0x73b   :  { %v1494_v17 = vsub.f32 %v877_v59, %v894_v3  ;;  %v978_v59 = vld [vmem:[%s1599_s4 + $0x10] sm:$0xff] }
 0x73c   :  { %1007 = vmatpush.msrb.mxu1 %v978_v59 }
 0x73d   :  { %v898_v4 = vmul.f32 %v1494_v17, %v1494_v17 }
 0x73e   :  { %1008 = vmatpush.msrb.mxu1 %v977_v60 }
 0x73f   :  { %v902_v5 = vsel %vm41_vm0, %v898_v4, 0.0 }
 0x740   :  { %903 = vadd.xlane.f32.xlu0 %v902_v5  ;;  %1009 = vmatpush.msrb.mxu1 %v976_v61 }
 0x7a5   :  { %v901_v11 = vpop.xlane.xlu2 %900 }
 0x7a6   :  { %v905_v12 = vmul.f32 %v901_v11, %v1489_v1 }
 0x7a8   :  { %v907_v14 = vadd.f32 1e-05, %v905_v12 }
 0x7aa   :  { %1184 = vrsqrt.f32 %v907_v14  ;;  %vm915_vm7 = vweird.f32 %v907_v14 }
 0x7b0   :  { %v1185_v19 = vpop.eup %1184 }
 0x7b1   :  { %v910_v23 = vmul.f32 %v1185_v19, %v907_v14  ;;  %vm916_vm6 = vweird.f32 %v1185_v19 }
 0x7b2   :  { %vm917_vm8 = vmor %vm915_vm7, %vm916_vm6 }
 0x7b3   :  { %v911_v25 = vmul.f32 %v1185_v19, %v910_v23  ;;  %v904_v26 = vpop.xlane.xlu0 %903 }
 0x7b4   :  { %v906_v27 = vmul.f32 %v904_v26, %v1489_v1 }
 0x7b5   :  { %v912_v29 = vmul.f32 0.5, %v911_v25 }
 0x7b6   :  { %v908_v30 = vadd.f32 1e-05, %v906_v27 }
 0x7b7   :  { %v913_v33 = vsub.f32 1.5, %v912_v29 }
 0x7b8   :  { %1186 = vrsqrt.f32 %v908_v30  ;;  %vm925_vm10 = vweird.f32 %v908_v30 }
 0x7b9   :  { %v914_v37 = vmul.f32 %v1185_v19, %v913_v33 }
 0x7bb   :  { %v918_v40 = vsel %vm917_vm8, %v1185_v19, %v914_v37 }
 0x7bc   :  { %v929_v41 = vmul.f32 %v918_v40, %v895_v35  ;;  %v1147_v35 = vld [vmem:[%s1601_s6 + $0x3] ss:$0 sm:$0xff] }
 0x7be   :  { %v1187_v44 = vpop.eup %1186  ;;  %v932_v45 = vmul.f32 %v1144_v38, %v929_v41 }
 0x7bf   :  { %v920_v47 = vmul.f32 %v1187_v44, %v908_v30  ;;  %vm926_vm9 = vweird.f32 %v1187_v44 }
 0x7c0   :  { %v935_v48 = vadd.f32 %v1145_v42, %v932_v45  ;;  %vm927_vm11 = vmor %vm925_vm10, %vm926_vm9 }
 0x7c1   :  { %v921_v50 = vmul.f32 %v1187_v44, %v920_v47 }
 0x7c2   :  { %1129 = vmatmul.msk.f32.vlgmr.msra.gmra.mxu0 %vm41_vm0, %v935_v48 }
 0x7c3   :  { %v922_v52 = vmul.f32 0.5, %v921_v50 }
 0x7c5   :  { %v923_v54 = vsub.f32 1.5, %v922_v52 }
 0x7c7   :  { %v924_v55 = vmul.f32 %v1187_v44, %v923_v54 }
 0x7c9   :  { %v928_v56 = vsel %vm927_vm11, %v1187_v44, %v924_v55 }
 0x7ca   :  { %v930_v57 = vmul.f32 %v928_v56, %v1494_v17 }
 0x7cc   :  { %v933_v58 = vmul.f32 %v1144_v38, %v930_v57 }
 0x7ce   :  { %v936_v31 = vadd.f32 %v1145_v42, %v933_v58  ;;  %v1149_v42 = vld [vmem:[%s1601_s6 + $0x5] ss:$0 sm:$0xff]  ;;  %s1079_s6 = sshll.u32 %s1602_s7, 4  ;;  %s1080_s6 = int_to_ptr.hbm [resolvable:$true] %s1079_s6 }
 0x7d0   :  { %1130 = vmatmul.msk.f32.gmra.mxu0 %vm41_vm0, %v936_v31 }
 0x83f   :  { %v968_v63 = vpop.f32.mrf.mxu0 }
 0x840   :  { %v969_v6 = vadd.f32 %v1146_v62, %v968_v63 }
 0x842   :  { %v974_v0 = vmax.f32 %v969_v6, 0.0 }
 0x844   :  { %1010 = vmatmul.f32.vlgmr.msrb.gmra.mxu1 %v974_v0 }
 0x84d   :  { %v971_v15 = vpop.f32.mrf.mxu0 }
 0x84e   :  { %v972_v34 = vadd.f32 %v1146_v62, %v971_v15 }
 0x850   :  { %v975_v18 = vmax.f32 %v972_v34, 0.0 }
 0x852   :  { %1013 = vmatmul.f32.gmra.mxu1 %v975_v18 }
 0x8c1   :  { %v1011_v16 = vpop.f32.mrf.mxu1 }
 0x8c2   :  { %v1012_v13 = vadd.f32 %v1147_v35, %v1011_v16 }
 0x8c4   :  { %v1017_v2 = vadd.f32 %v1012_v13, %v935_v48 }
 0x8c6   :  { %v1021_v3 = vsel %vm41_vm0, %v1017_v2, 0.0 }
 0x8c7   :  { %1022 = vadd.xlane.f32.xlu1 %v1021_v3 }
 0x8cf   :  { %v1014_v17 = vpop.f32.mrf.mxu1 }
 0x8d0   :  { %v1015_v4 = vadd.f32 %v1147_v35, %v1014_v17 }
 0x8d2   :  { %v1018_v5 = vadd.f32 %v1015_v4, %v936_v31 }
 0x8d4   :  { %v1024_v7 = vsel %vm41_vm0, %v1018_v5, 0.0 }
 0x8d5   :  { %1025 = vadd.xlane.f32.xlu2 %v1024_v7 }
 0x93a   :  { %v1023_v8 = vpop.xlane.xlu1 %1022 }
 0x93b   :  { %v1027_v9 = vmul.f32 %v1023_v8, %v1489_v1 }
 0x93d   :  { %v1029_v10 = vsub.f32 %v1017_v2, %v1027_v9 }
 0x93f   :  { %v1031_v11 = vmul.f32 %v1029_v10, %v1029_v10 }
 0x941   :  { %v1033_v12 = vsel %vm41_vm0, %v1031_v11, 0.0 }
 0x942   :  { %1034 = vadd.xlane.f32.xlu2 %v1033_v12 }
 0x948   :  { %v1026_v14 = vpop.xlane.xlu2 %1025 }
 0x949   :  { %v1028_v19 = vmul.f32 %v1026_v14, %v1489_v1 }
 0x94b   :  { %v1030_v20 = vsub.f32 %v1018_v5, %v1028_v19 }
 0x94d   :  { %v1032_v22 = vmul.f32 %v1030_v20, %v1030_v20 }
 0x94f   :  { %v1036_v23 = vsel %vm41_vm0, %v1032_v22, 0.0 }
 0x950   :  { %1037 = vadd.xlane.f32.xlu2 %v1036_v23 }
 0x9b5   :  { %v1035_v24 = vpop.xlane.xlu2 %1034 }
 0x9b6   :  { %v1039_v25 = vmul.f32 %v1035_v24, %v1489_v1 }
 0x9b8   :  { %v1041_v26 = vadd.f32 1e-05, %v1039_v25 }
 0x9ba   :  { %1188 = vrsqrt.f32 %v1041_v26  ;;  %vm1049_vm13 = vweird.f32 %v1041_v26 }
 0x9c0   :  { %v1189_v27 = vpop.eup %1188 }
 0x9c1   :  { %v1044_v28 = vmul.f32 %v1189_v27, %v1041_v26  ;;  %vm1050_vm12 = vweird.f32 %v1189_v27 }
 0x9c2   :  { %vm1051_vm14 = vmor %vm1049_vm13, %vm1050_vm12 }
 0x9c3   :  { %v1045_v29 = vmul.f32 %v1189_v27, %v1044_v28  ;;  %v1038_v30 = vpop.xlane.xlu2 %1037 }
 0x9c4   :  { %v1040_v32 = vmul.f32 %v1038_v30, %v1489_v1 }
 0x9c5   :  { %v1046_v33 = vmul.f32 0.5, %v1045_v29 }
 0x9c6   :  { %v1042_v36 = vadd.f32 1e-05, %v1040_v32 }
 0x9c7   :  { %v1047_v37 = vsub.f32 1.5, %v1046_v33 }
 0x9c8   :  { %1190 = vrsqrt.f32 %v1042_v36  ;;  %vm1059_vm2 = vweird.f32 %v1042_v36 }
 0x9c9   :  { %v1048_v38 = vmul.f32 %v1189_v27, %v1047_v37 }
 0x9cb   :  { %v1052_v40 = vsel %vm1051_vm14, %v1189_v27, %v1048_v38 }
 0x9cc   :  { %v1063_v41 = vmul.f32 %v1052_v40, %v1029_v10 }
 0x9ce   :  { %v1191_v43 = vpop.eup %1190  ;;  %v1066_v1 = vmul.f32 %v1148_v39, %v1063_v41 }
 0x9cf   :  { %v1054_v44 = vmul.f32 %v1191_v43, %v1042_v36  ;;  %vm1060_vm15 = vweird.f32 %v1191_v43 }
 0x9d0   :  { %v1069_v45 = vadd.f32 %v1149_v42, %v1066_v1  ;;  %vm1061_vm3 = vmor %vm1059_vm2, %vm1060_vm15 }
 0x9d1   :  { %v1055_v46 = vmul.f32 %v1191_v43, %v1054_v44 }
 0x9d2   :  { %1071 = vst.msk [vmem:[#allocation2] sm:$0xff] %vm41_vm0, %v1069_v45 }
 0x9d3   :  { %v1056_v47 = vmul.f32 0.5, %v1055_v46 }
 0x9d5   :  { %v1057_v48 = vsub.f32 1.5, %v1056_v47 }
 0x9d7   :  { %v1058_v49 = vmul.f32 %v1191_v43, %v1057_v48 }
 0x9d9   :  { %v1062_v50 = vsel %vm1061_vm3, %v1191_v43, %v1058_v49 }
 0x9da   :  { %v1064_v51 = vmul.f32 %v1062_v50, %v1030_v20 }
 0x9dc   :  { %v1067_v52 = vmul.f32 %v1148_v39, %v1064_v51 }
 0x9de   :  { %v1070_v53 = vadd.f32 %v1149_v42, %v1067_v52 }
 0x9e0   :  { %1072 = vst.msk [vmem:[#allocation2 + $0x8] sm:$0xff] %vm41_vm0, %v1070_v53 }
 0x9e1   :  { %1085 = dma.vmem_to_hbm [thread:$0]  %s1078_s13, 256, %s1080_s6, [#allocation3], %s1223_s2, %s1223_s2, %s1224_s16  }
 0x9e2   :  { %1216 = dma.done.wait [#allocation3], 256  }
 0x9e3   :  { %1217 = vsyncadd [#allocation3], 4294967040 }
 0x9e4   :  { %1090 = vsyncpa [#allocation3], 1 }

</bundles_post_ra>
